<compile_context>
chip_gen: v5e
topology: v5e:2x2
jax: 0.10.0
libtpu: 0.0.40
codegen_flags: <defaults>
</compile_context>

<pallas_src>
import functools

import jax
import jax.numpy as jnp
from jax import lax
from jax.experimental import pallas as pl
from jax.experimental.pallas import tpu as pltpu

_KT = 27  # 3*3*3 taps


# ----------------------------------------------------------------------------
# Kernel
# ----------------------------------------------------------------------------
def _silu(z):
    return z * (1.0 / (1.0 + jnp.exp(-z)))


def _group_norm_silu(u, avg, gamma, beta, inv_n, eps=1e-5):
    """GroupNorm (group structure encoded in `avg`) followed by SiLU.  u: (c, N)."""
    gm = jnp.dot(avg, u, preferred_element_type=jnp.float32)        # group-sum / gsize
    gm2 = jnp.dot(avg, u * u, preferred_element_type=jnp.float32)
    mu = jnp.sum(gm, axis=1, keepdims=True) * inv_n                 # (c, 1) group mean
    ms = jnp.sum(gm2, axis=1, keepdims=True) * inv_n                # (c, 1) group E[x^2]
    var = ms - mu * mu
    inv = lax.rsqrt(var + eps)
    y = (u - mu) * (inv * gamma) + beta
    return _silu(y)


def _dcdw_kernel(x_ref, maskf_ref,
                 wk_ref, bk_ref, wv_ref, bv_ref,
                 wa1k_ref, wa1x_ref, ba1_ref, wa2_ref, ba2_ref,
                 gn1a_ref, gn1g_ref, gn1b_ref,
                 w2_ref, b2_ref,
                 gn2a_ref, gn2g_ref, gn2b_ref,
                 out_ref,
                 patch_ref,
                 *, C, N, shifts):
    """One batch element.  x_ref: (1, C, N), out_ref: (1, Cout, N)."""
    inv_n = 1.0 / N
    x = x_ref[0]                                                    # (C, N)

    def conv3x3x3(src, w_ref, b_ref):
        # im2col: assemble the 27-tap patch matrix (27*C, N) in VMEM scratch
        # (lane rotation + zero mask for out-of-volume taps), then ONE MXU matmul.
        for t in range(_KT):
            sh = shifts[t]
            rolled = src if sh == 0 else pltpu.roll(src, sh, 1)
            m = maskf_ref[t * C:(t + 1) * C, :]                     # aligned (C, N) block
            patch_ref[t * C:(t + 1) * C, :] = rolled * m
        return jnp.dot(w_ref[...], patch_ref[...],
                       preferred_element_type=jnp.float32) + b_ref[...]

    # ---- CoTAttention(dim=C, kernel_size=3) ---------------------------------
    k1 = _silu(conv3x3x3(x, wk_ref, bk_ref))                        # key_embed (BN folded)
    v = jnp.dot(wv_ref[...], x, preferred_element_type=jnp.float32) + bv_ref[...]
    # attention_embed(cat([k1, x])): concat avoided by splitting the 1x1 weight.
    a1 = _silu(jnp.dot(wa1k_ref[...], k1, preferred_element_type=jnp.float32)
               + jnp.dot(wa1x_ref[...], x, preferred_element_type=jnp.float32)
               + ba1_ref[...])
    # second 1x1 conv; the mean over the k*k attention maps is folded into wa2.
    att = jnp.dot(wa2_ref[...], a1, preferred_element_type=jnp.float32) + ba2_ref[...]
    # softmax over the flattened spatial dim (lanes), per channel
    m = jnp.max(att, axis=1, keepdims=True)
    e = jnp.exp(att - m)
    s = jnp.sum(e, axis=1, keepdims=True)
    k2 = (e * pl.reciprocal(s, approx=True)) * v
    u = k1 + k2                                                     # (C, N)

    # ---- GroupNorm(8, C) + SiLU ----------------------------------------------
    z = _group_norm_silu(u, gn1a_ref[...], gn1g_ref[...], gn1b_ref[...], inv_n)

    # ---- Conv3d(C -> Cout, k=3, pad=1) + bias --------------------------------
    c2 = conv3x3x3(z, w2_ref, b2_ref)                               # (Cout, N)

    # ---- GroupNorm(8, Cout) + SiLU --------------------------------------------
    out_ref[0] = _group_norm_silu(c2, gn2a_ref[...], gn2g_ref[...], gn2b_ref[...], inv_n)


# ----------------------------------------------------------------------------
# pallas_call wrapper
# ----------------------------------------------------------------------------
def _full_spec(shape):
    zeros = (0,) * len(shape)
    return pl.BlockSpec(shape, lambda b, _z=zeros: _z)


def _detect_roll_shift_sign():
    """pltpu.roll is documented to match jnp.roll; verify the lane-rotation
    direction once so the im2col shift signs are always correct."""
    x = jnp.arange(8 * 128, dtype=jnp.float32).reshape(8, 128)

    def kern(x_ref, o_ref):
        o_ref[...] = pltpu.roll(x_ref[...], 1, 1)

    y = jax.device_get(
        pl.pallas_call(kern, out_shape=jax.ShapeDtypeStruct((8, 128), jnp.float32))(x))
    # jnp.roll convention: element 0 moves to index 1  ->  shift = -offset
    return -1 if float(y[0, 1]) == 0.0 else 1


def double_conv_down_wcot(x, params, roll_sign=-1):
    """x: (bs, C, H, W, D) float32 (PyTorch layout) -> (bs, Cout, H, W, D)."""
    bs, C, H, W, D = x.shape
    N = H * W * D
    Cout = params['w2'].shape[0]
    shifts = tuple(int((roll_sign * off) % N) for off in params['offs'])

    kern = functools.partial(_dcdw_kernel, C=C, N=N, shifts=shifts)
    x_cn = x.reshape(bs, C, N).astype(jnp.float32)

    tensor_args = (x_cn, params['maskf'],
                   params['wk'], params['bk'], params['wv'], params['bv'],
                   params['wa1k'], params['wa1x'], params['ba1'],
                   params['wa2'], params['ba2'],
                   params['gn1a'], params['gn1g'], params['gn1b'],
                   params['w2'], params['b2'],
                   params['gn2a'], params['gn2g'], params['gn2b'])
    in_specs = [pl.BlockSpec((1, C, N), lambda b: (b, 0, 0))]
    in_specs += [_full_spec(a.shape) for a in tensor_args[1:]]

    out = pl.pallas_call(
        kern,
        out_shape=jax.ShapeDtypeStruct((bs, Cout, N), jnp.float32),
        grid=(bs,),
        in_specs=in_specs,
        out_specs=pl.BlockSpec((1, Cout, N), lambda b: (b, 0, 0)),
        scratch_shapes=[pltpu.VMEM((_KT * C, N), jnp.float32)],
        compiler_params=pltpu.CompilerParams(
            dimension_semantics=("parallel",),           # v7x: batch elements on both TCs
            vmem_limit_bytes=16 * 1024 * 1024),          # actual footprint ~2 MiB
    )(*tensor_args)
    return out.reshape(bs, Cout, H, W, D)


# ----------------------------------------------------------------------------
# Parameter construction (PyTorch __init__ shapes) + folding into kernel form
# ----------------------------------------------------------------------------
def _bn_params(key, c):
    k1, k2, k3, k4 = jax.random.split(key, 4)
    gamma = 1.0 + 0.1 * jax.random.normal(k1, (c,), jnp.float32)
    beta = 0.05 * jax.random.normal(k2, (c,), jnp.float32)
    mean = 0.1 * jax.random.normal(k3, (c,), jnp.float32)
    var = jax.random.uniform(k4, (c,), jnp.float32, minval=0.5, maxval=1.5)
    return gamma, beta, mean, var


def init_raw_params(key, C, Cout):
    keys = jax.random.split(key, 14)
    Cpg = C // 4
    Cmid = 2 * C // 4
    return dict(
        wk=0.1 * jax.random.normal(keys[0], (C, Cpg, 3, 3, 3), jnp.float32),
        bn1=_bn_params(keys[1], C),
        wv=0.1 * jax.random.normal(keys[2], (C, C), jnp.float32),
        bn2=_bn_params(keys[3], C),
        wa1=0.1 * jax.random.normal(keys[4], (Cmid, 2 * C), jnp.float32),
        bn3=_bn_params(keys[5], Cmid),
        wa2=0.1 * jax.random.normal(keys[6], (9 * C, Cmid), jnp.float32),
        ba2=0.05 * jax.random.normal(keys[7], (9 * C,), jnp.float32),
        gn1_g=1.0 + 0.1 * jax.random.normal(keys[8], (C,), jnp.float32),
        gn1_b=0.05 * jax.random.normal(keys[9], (C,), jnp.float32),
        w2=0.1 * jax.random.normal(keys[10], (Cout, C, 3, 3, 3), jnp.float32),
        b2=0.05 * jax.random.normal(keys[11], (Cout,), jnp.float32),
        gn2_g=1.0 + 0.1 * jax.random.normal(keys[12], (Cout,), jnp.float32),
        gn2_b=0.05 * jax.random.normal(keys[13], (Cout,), jnp.float32),
    )


def _tap_masks_and_offsets(H, W, D):
    hh = jnp.arange(H)[:, None, None]
    ww = jnp.arange(W)[None, :, None]
    dd = jnp.arange(D)[None, None, :]
    masks, offs = [], []
    for i in range(3):
        for j in range(3):
            for l in range(3):
                a, b, c = i - 1, j - 1, l - 1
                valid = ((hh + a >= 0) & (hh + a < H) &
                         (ww + b >= 0) & (ww + b < W) &
                         (dd + c >= 0) & (dd + c < D))
                masks.append(valid.reshape(-1))
                offs.append(a * W * D + b * D + c)
    return jnp.stack(masks).astype(jnp.float32), tuple(offs)


def _group_avg_matrix(c, num_groups):
    gs = c // num_groups
    groups = jnp.arange(c) // gs
    return (groups[:, None] == groups[None, :]).astype(jnp.float32) / gs


def fold_params(raw, C, Cout, H, W, D):
    """Fold eval-mode BN into conv weights, build dense im2col weights, and
    precompute the tap masks / offsets and GroupNorm group-averaging matrices."""
    eps = 1e-5
    Cpg = C // 4
    Cmid = 2 * C // 4

    # key_embed grouped 3x3x3 conv + BN1, as a dense (C, 27*C) im2col weight.
    g1, be1, m1, v1 = raw['bn1']
    s1 = g1 / jnp.sqrt(v1 + eps)
    wk_t = jnp.transpose(raw['wk'], (0, 2, 3, 4, 1)).reshape(C, _KT, Cpg)
    dense = jnp.zeros((C, _KT, C), jnp.float32)
    for g in range(4):
        dense = dense.at[g * Cpg:(g + 1) * Cpg, :, g * Cpg:(g + 1) * Cpg].set(
            wk_t[g * Cpg:(g + 1) * Cpg])
    wk = dense.reshape(C, _KT * C) * s1[:, None]
    bk = (be1 - m1 * s1).reshape(C, 1)

    # value_embed 1x1x1 conv + BN2
    g2, be2, m2, v2 = raw['bn2']
    s2 = g2 / jnp.sqrt(v2 + eps)
    wv = raw['wv'] * s2[:, None]
    bv = (be2 - m2 * s2).reshape(C, 1)

    # attention_embed conv1 (on cat([k1, x])) + BN3, split to avoid the concat
    g3, be3, m3, v3 = raw['bn3']
    s3 = g3 / jnp.sqrt(v3 + eps)
    wa1 = raw['wa1'] * s3[:, None]
    wa1k, wa1x = wa1[:, :C], wa1[:, C:]
    ba1 = (be3 - m3 * s3).reshape(Cmid, 1)

    # attention_embed conv2; fold the mean over the k*k attention maps
    wa2 = raw['wa2'].reshape(C, 9, Cmid).mean(axis=1)
    ba2 = raw['ba2'].reshape(C, 9).mean(axis=1).reshape(C, 1)

    # final Conv3d(C -> Cout, 3x3x3, bias) as a dense (Cout, 27*C) im2col weight
    w2 = jnp.transpose(raw['w2'], (0, 2, 3, 4, 1)).reshape(Cout, _KT * C)
    b2 = raw['b2'].reshape(Cout, 1)

    mask27, offs = _tap_masks_and_offsets(H, W, D)
    maskf = jnp.repeat(mask27, C, axis=0)                     # (27*C, N), matches patch rows

    return dict(
        wk=wk, bk=bk, wv=wv, bv=bv,
        wa1k=wa1k, wa1x=wa1x, ba1=ba1, wa2=wa2, ba2=ba2,
        gn1a=_group_avg_matrix(C, 8),
        gn1g=raw['gn1_g'].reshape(C, 1), gn1b=raw['gn1_b'].reshape(C, 1),
        w2=w2, b2=b2,
        gn2a=_group_avg_matrix(Cout, 8),
        gn2g=raw['gn2_g'].reshape(Cout, 1), gn2b=raw['gn2_b'].reshape(Cout, 1),
        maskf=maskf, offs=offs,
    )


# ----------------------------------------------------------------------------
# Pure-JAX reference (mirrors the PyTorch module, eval-mode BN), for checking
# ----------------------------------------------------------------------------
def ref_forward(x, raw):
    eps = 1e-5
    HP = lax.Precision.HIGHEST
    bs, C, H, W, D = x.shape
    N = H * W * D
    Cout = raw['w2'].shape[0]

    def bn(z, p):
        g, b, m, v = p
        sh = (1, -1, 1, 1, 1)
        return (g.reshape(sh) * (z - m.reshape(sh)) / jnp.sqrt(v.reshape(sh) + eps)
                + b.reshape(sh))

    def silu(z):
        return z * jax.nn.sigmoid(z)

    def gn(z, gamma, beta, G):
        zz = z.reshape(bs, G, -1)
        mu = zz.mean(axis=2, keepdims=True)
        var = zz.var(axis=2, keepdims=True)
        zz = (zz - mu) / jnp.sqrt(var + eps)
        zz = zz.reshape(z.shape)
        sh = (1, -1, 1, 1, 1)
        return zz * gamma.reshape(sh) + beta.reshape(sh)

    def conv3(z, w, groups):
        zl = jnp.transpose(z, (0, 2, 3, 4, 1))
        wl = jnp.transpose(w, (2, 3, 4, 1, 0))
        o = lax.conv_general_dilated(zl, wl, (1, 1, 1), 'SAME',
                                     dimension_numbers=('NHWDC', 'HWDIO', 'NHWDC'),
                                     feature_group_count=groups, precision=HP)
        return jnp.transpose(o, (0, 4, 1, 2, 3))

    # CoTAttention(C, 3)
    k1 = silu(bn(conv3(x, raw['wk'], 4), raw['bn1']))
    v = bn(jnp.einsum('oc,bchwd->bohwd', raw['wv'], x, precision=HP), raw['bn2'])
    y = jnp.concatenate([k1, x], axis=1)
    a1 = silu(bn(jnp.einsum('oc,bchwd->bohwd', raw['wa1'], y, precision=HP), raw['bn3']))
    att = (jnp.einsum('oc,bchwd->bohwd', raw['wa2'], a1, precision=HP)
           + raw['ba2'].reshape(1, -1, 1, 1, 1))
    att = att.reshape(bs, C, 9, H, W, D).mean(axis=2).reshape(bs, C, N)
    k2 = jax.nn.softmax(att, axis=-1) * v.reshape(bs, C, N)
    u = k1 + k2.reshape(bs, C, H, W, D)

    # GroupNorm + SiLU
    u = silu(gn(u, raw['gn1_g'], raw['gn1_b'], 8))
    # Conv3d(C, Cout, 3, padding=1) + bias
    z = conv3(u, raw['w2'], 1) + raw['b2'].reshape(1, -1, 1, 1, 1)
    # GroupNorm + SiLU
    return silu(gn(z, raw['gn2_g'], raw['gn2_b'], 8))


# ----------------------------------------------------------------------------
if __name__ == "__main__":
    key = jax.random.PRNGKey(0)
    # GroupNorm(num_groups=8) and CoT groups=4 => channels divisible by 8
    bs, C, Cout, H, W, D = 2, 8, 16, 8, 8, 8          # N = 512 lanes
    kx, kp = jax.random.split(key)
    x = jax.random.normal(kx, (bs, C, H, W, D), jnp.float32)   # PyTorch layout

    raw = init_raw_params(kp, C, Cout)
    params = fold_params(raw, C, Cout, H, W, D)
    roll_sign = _detect_roll_shift_sign()

    out = jax.block_until_ready(double_conv_down_wcot(x, params, roll_sign))
    assert out.shape == (bs, Cout, H, W, D)

    ref = jax.block_until_ready(ref_forward(x, raw))
    if not bool(jnp.allclose(out, ref, atol=2e-3, rtol=2e-3)):
        err = float(jnp.max(jnp.abs(out - ref)))
        raise AssertionError(
            f"Pallas kernel output does not match reference (max abs err {err})")

    print("KERNEL_OK")
</pallas_src>

<mosaic_0001>
module attributes {stable_mosaic.version = 11 : i64} {
  func.func @kern(%arg0: memref<8x128xf32, #tpu.memory_space<vmem>>, %arg1: memref<8x128xf32, #tpu.memory_space<vmem>>) attributes {dimension_semantics = [], scalar_prefetch = 0 : i64, scratch_operands = 0 : i64, tpu.core_type = #tpu.core_type<tc>} {
    %c0 = arith.constant 0 : index
    %c0_0 = arith.constant 0 : index
    %0 = vector.load %arg0[%c0, %c0_0] : memref<8x128xf32, #tpu.memory_space<vmem>>, vector<8x128xf32>
    %c1_i32 = arith.constant 1 : i32
    %1 = tpu.dynamic_rotate %0 by %c1_i32 dim 1 : vector<8x128xf32>, i32 -> vector<8x128xf32>
    %c0_1 = arith.constant 0 : index
    %c0_2 = arith.constant 0 : index
    %2 = vector.load %arg1[%c0_1, %c0_2] : memref<8x128xf32, #tpu.memory_space<vmem>>, vector<8x128xf32>
    tpu.vector_store %arg1[%c0_1, %c0_2], %1 {strides = array<i32>} : memref<8x128xf32, #tpu.memory_space<vmem>>, vector<8x128xf32>,
    return
  }
}

</mosaic_0001>

<bundles_post_ra>
// kernel: tpu_custom_call.1
= control target key start
LH: loop header
LB: loop body
LE: loop exit
PB: predicated region body
PF: predicated region fallthrough
CT: control target
= control target key end

     0   :  { %6 = vsyncpa [#allocation3], 0  ;;  %s118_s0 = inlined_call_operand.hbm [shape: f32[8,128], index: 0, kind: input, shape index: {}]   ;;  %s119_s1 = inlined_call_operand.hbm [shape: f32[8,128], index: 1, kind: output, shape index: {}]  }
   0x1   :  { %7 = vsyncpa [#allocation4], 0  ;;  %s13_s8 = sshll.u32 %s118_s0, 4  ;;  %s99_s9 = smov [#allocation2]   ;;  %s14_s8 = int_to_ptr.hbm [resolvable:$true] %s13_s8 }
   0x2   :  { %s15_s10 = sshll.u32 %s99_s9, 4  ;;  %s16_s10 = int_to_ptr.vmem [resolvable:$true] %s15_s10 }
   0x3   :  { %18 = dma.hbm_to_vmem [thread:$0]  %s14_s8, 128, %s16_s10, [#allocation3]  }
   0x4   :  { %95 = dma.done.wait [#allocation3], 128  }
   0x5   :  { %96 = vsyncadd [#allocation3], 4294967168  ;;  %v23_v0 = vld [vmem:[#allocation2] sm:$0xff]  ;;  %s100_s11 = smov 1   ;;  %s101_s12 = smov [#allocation5]  }
   0x6   :  { %24 = vrot.lane.b32.xlu0 %v23_v0, %s100_s11  ;;  %s32_s13 = sshll.u32 %s101_s12, 4  ;;  %s34_s16 = sshll.u32 %s119_s1, 4  ;;  %s33_s13 = int_to_ptr.vmem [resolvable:$true] %s32_s13  ;;  %s35_s16 = int_to_ptr.hbm [resolvable:$true] %s34_s16 }
  0x78   :  { %v25_v1 = vpop.permute.xlu0 %24 }
  0x79   :  { %26 = vst [vmem:[#allocation5] sm:$0xff] %v25_v1 }
  0x7a   :  { %37 = dma.vmem_to_hbm [thread:$0]  %s33_s13, 128, %s35_s16, [#allocation4]  }
  0x7b   :  { %97 = dma.done.wait [#allocation4], 128  }
  0x7c   :  { %98 = vsyncadd [#allocation4], 4294967168 }
  0x7d   :  { %42 = vsyncpa [#allocation3], 1 }
  0x7e   :  { %43 = vsyncpa [#allocation4], 1 }

</bundles_post_ra>
